<compile_context>
chip_gen: v5e
topology: v5e:2x2
jax: 0.10.0
libtpu: 0.0.40
codegen_flags: <defaults>
</compile_context>

<pallas_src>
import functools

import jax
import jax.numpy as jnp
from jax import lax
from jax.experimental import pallas as pl
from jax.experimental.pallas import tpu as pltpu


def _round_up(a, m):
    return ((a + m - 1) // m) * m


def _causal_conv1d_kernel(x_ref, w_ref, b_ref, o_ref, *scratch, kernel_size,
                          dilation, tile_len, pad, update_carry):
    """One (batch, time-tile) grid step.

    x_ref:   (1, Cin, TL)   current input tile, time on lanes (lane-dense)
    w_ref:   (K, Cout, Cin) weights, tap-major
    b_ref:   (Cout, 1)      bias
    o_ref:   (1, Cout, TL)  output tile (lane-dense stores)
    scratch: [(Cin, pad)]   persistent VMEM causal-halo carry (only when pad > 0)
    """
    cout = o_ref.shape[1]

    if pad > 0:
        halo_ref = scratch[0]

        # First time tile of every sequence: the causal left-padding is zeros.
        @pl.when(pl.program_id(1) == 0)
        def _zero_halo():
            halo_ref[...] = jnp.zeros_like(halo_ref)

        # [causal halo | current tile] -> (Cin, TL + pad), assembled in registers
        # (no full-tile VMEM round-trip; only `pad` columns live in scratch).
        window = jnp.concatenate([halo_ref[...], x_ref[0]], axis=-1)
    else:
        window = x_ref[0]                                   # (Cin, TL)

    # out[co, t] = b[co] + sum_j sum_ci w[j, co, ci] * window[ci, t + j*dilation]
    # Bias folded into the accumulator init; f32 accumulation on the MXU.
    acc = jnp.broadcast_to(b_ref[...], (cout, tile_len)).astype(jnp.float32)
    for j in range(kernel_size):                            # static unroll over taps
        tap = window[:, j * dilation: j * dilation + tile_len]       # (Cin, TL)
        acc = acc + jnp.dot(w_ref[j], tap, preferred_element_type=jnp.float32)
    o_ref[0] = acc.astype(o_ref.dtype)                      # lane-dense store

    if update_carry:
        # Tail of the current tile becomes the causal halo of the next time tile.
        scratch[0][...] = window[:, tile_len:]


def causal_conv1d(x_ncl, weight, bias, *, dilation=1, time_tile=1024):
    """x_ncl: (N, Cin, L); weight: (Cout, Cin, K) [PyTorch layout]; bias: (Cout,)."""
    n, cin, length = x_ncl.shape
    cout, cin_w, k = weight.shape
    assert cin == cin_w, (cin, cin_w)
    pad = (k - 1) * dilation

    # Time tiling: whole (short) sequence in one tile, otherwise a 128-aligned tile
    # that is >= pad so a single previous tile provides all needed causal history.
    if length <= max(time_tile, pad):
        tl = length
    else:
        tl = _round_up(max(time_tile, pad), 128)
        if tl >= length:
            tl = length
    num_t = pl.cdiv(length, tl)                              # ragged tail OK

    # Parameter-side reshapes are tiny (K*Cin*Cout elements).
    w_koc = jnp.transpose(weight, (2, 0, 1))                 # (K, Cout, Cin)
    b_2d = bias.reshape(cout, 1)

    update_carry = (num_t > 1 and pad > 0)
    scratch_shapes = [pltpu.VMEM((cin, pad), x_ncl.dtype)] if pad > 0 else []

    kernel = functools.partial(
        _causal_conv1d_kernel,
        kernel_size=k, dilation=dilation, tile_len=tl, pad=pad,
        update_carry=update_carry,
    )

    return pl.pallas_call(
        kernel,
        out_shape=jax.ShapeDtypeStruct((n, cout, length), x_ncl.dtype),
        grid_spec=pltpu.PrefetchScalarGridSpec(
            num_scalar_prefetch=0,
            grid=(n, num_t),
            in_specs=[
                pl.BlockSpec((1, cin, tl), lambda b, t: (b, 0, t)),
                pl.BlockSpec((k, cout, cin), lambda b, t: (0, 0, 0)),
                pl.BlockSpec((cout, 1), lambda b, t: (0, 0)),
            ],
            out_specs=pl.BlockSpec((1, cout, tl), lambda b, t: (b, 0, t)),
            scratch_shapes=scratch_shapes,
        ),
        compiler_params=pltpu.CompilerParams(
            # Batch tiles are independent (megacore-shardable); the time axis carries
            # the causal halo in scratch, so it must iterate in order.
            dimension_semantics=("parallel", "arbitrary"),
        ),
    )(x_ncl, w_koc, b_2d)


def _reference_causal_conv1d(x_ncl, weight, bias, *, dilation=1):
    """Pure-JAX reference mimicking the PyTorch module exactly (pad==0 guarded)."""
    k = weight.shape[-1]
    pad = (k - 1) * dilation
    y = lax.conv_general_dilated(
        x_ncl, weight,
        window_strides=(1,),
        padding=[(pad, pad)],
        rhs_dilation=(dilation,),
        dimension_numbers=("NCH", "OIH", "NCH"),
    ) + bias[None, :, None]
    return y if pad == 0 else y[:, :, :-pad]


if __name__ == "__main__":
    batch, in_channels, out_channels = 2, 4, 8
    kernel_size, dilation = 3, 2

    key = jax.random.PRNGKey(0)
    kx, kw, kb, kx2, kx3 = jax.random.split(key, 5)

    # PyTorch Conv1d weight layout: (Cout, Cin, K).
    fan_in = in_channels * kernel_size
    bound = 1.0 / (fan_in ** 0.5)
    weight = jax.random.uniform(kw, (out_channels, in_channels, kernel_size),
                                minval=-bound, maxval=bound, dtype=jnp.float32)
    bias = jax.random.uniform(kb, (out_channels,), minval=-bound, maxval=bound,
                              dtype=jnp.float32)

    # --- Test 1: small shapes, single time tile ---
    length = 16
    x = jax.random.normal(kx, (batch, in_channels, length), dtype=jnp.float32)
    out = jax.block_until_ready(causal_conv1d(x, weight, bias, dilation=dilation))
    ref = _reference_causal_conv1d(x, weight, bias, dilation=dilation)
    assert out.shape == (batch, out_channels, length), out.shape
    assert jnp.allclose(out, ref, atol=1e-4, rtol=1e-4), float(jnp.max(jnp.abs(out - ref)))

    # --- Test 2: longer sequence, time-tiled path with halo carry (exact tiling) ---
    length2 = 512
    x2 = jax.random.normal(kx2, (batch, in_channels, length2), dtype=jnp.float32)
    out2 = jax.block_until_ready(
        causal_conv1d(x2, weight, bias, dilation=dilation, time_tile=128))
    ref2 = _reference_causal_conv1d(x2, weight, bias, dilation=dilation)
    assert out2.shape == (batch, out_channels, length2), out2.shape
    assert jnp.allclose(out2, ref2, atol=1e-4, rtol=1e-4), float(jnp.max(jnp.abs(out2 - ref2)))

    # --- Test 3: ragged length (last time tile partial -> bounded DMA path) ---
    length3 = 300
    x3 = jax.random.normal(kx3, (batch, in_channels, length3), dtype=jnp.float32)
    out3 = jax.block_until_ready(
        causal_conv1d(x3, weight, bias, dilation=dilation, time_tile=128))
    ref3 = _reference_causal_conv1d(x3, weight, bias, dilation=dilation)
    assert out3.shape == (batch, out_channels, length3), out3.shape
    assert jnp.allclose(out3, ref3, atol=1e-4, rtol=1e-4), float(jnp.max(jnp.abs(out3 - ref3)))

    print("KERNEL_OK")
</pallas_src>

<mosaic_0001>
module attributes {stable_mosaic.version = 11 : i64} {
  func.func @_causal_conv1d_kernel(%arg0: i32, %arg1: i32, %arg2: memref<1x4x16xf32, #tpu.memory_space<vmem>>, %arg3: memref<3x8x4xf32, #tpu.memory_space<vmem>>, %arg4: memref<8x1xf32, #tpu.memory_space<vmem>>, %arg5: memref<1x8x16xf32, #tpu.memory_space<vmem>>, %arg6: memref<4x4xf32, #tpu.memory_space<vmem>>) attributes {dimension_semantics = [#tpu.dimension_semantics<parallel>, #tpu.dimension_semantics<arbitrary>], iteration_bounds = array<i64: 2, 1>, scalar_prefetch = 0 : i64, scratch_operands = 1 : i64, tpu.core_type = #tpu.core_type<tc>, window_params = [{transform_indices = @transform_0, window_bounds = array<i64: 1, 4, 16>}, {pipeline_mode = #tpu.pipeline_mode<synchronous>, transform_indices = @transform_1, window_bounds = array<i64: 3, 8, 4>}, {pipeline_mode = #tpu.pipeline_mode<synchronous>, transform_indices = @transform_2, window_bounds = array<i64: 8, 1>}, {transform_indices = @transform_3, window_bounds = array<i64: 1, 8, 16>}]} {
    %c0_i32 = arith.constant 0 : i32
    %0 = arith.cmpi eq, %arg1, %c0_i32 : i32
    %1 = arith.extui %0 : i1 to i32
    %c0_i32_0 = arith.constant 0 : i32
    %2 = arith.cmpi ne, %1, %c0_i32_0 : i32
    scf.if %2 {
      %cst_19 = arith.constant 0.000000e+00 : f32
      %28 = vector.broadcast %cst_19 : f32 to vector<4x4xf32>
      %c0_20 = arith.constant 0 : index
      %c0_21 = arith.constant 0 : index
      %29 = vector.load %arg6[%c0_20, %c0_21] : memref<4x4xf32, #tpu.memory_space<vmem>>, vector<4x4xf32>
      tpu.vector_store %arg6[%c0_20, %c0_21], %28 {strides = array<i32>} : memref<4x4xf32, #tpu.memory_space<vmem>>, vector<4x4xf32>,
    } else {
    }
    %c0 = arith.constant 0 : index
    %c0_1 = arith.constant 0 : index
    %3 = vector.load %arg6[%c0, %c0_1] : memref<4x4xf32, #tpu.memory_space<vmem>>, vector<4x4xf32>
    %c0_2 = arith.constant 0 : index
    %c0_3 = arith.constant 0 : index
    %c0_4 = arith.constant 0 : index
    %4 = vector.load %arg2[%c0_2, %c0_3, %c0_4] : memref<1x4x16xf32, #tpu.memory_space<vmem>>, vector<1x4x16xf32>
    %5 = vector.shape_cast %4 : vector<1x4x16xf32> to vector<4x16xf32>
    %6 = tpu.concatenate %3, %5 in 1 : vector<4x4xf32>, vector<4x16xf32> -> vector<4x20xf32>
    %c0_5 = arith.constant 0 : index
    %c0_6 = arith.constant 0 : index
    %7 = vector.load %arg4[%c0_5, %c0_6] : memref<8x1xf32, #tpu.memory_space<vmem>>, vector<8x1xf32>
    %8 = vector.shape_cast %7 : vector<8x1xf32> to vector<8x1xf32>
    %9 = vector.broadcast %8 : vector<8x1xf32> to vector<8x16xf32>
    %10 = vector.extract_strided_slice %6 {offsets = [0, 0], sizes = [4, 16], strides = [1, 1]} : vector<4x20xf32> to vector<4x16xf32>
    %c0_7 = arith.constant 0 : index
    %c0_8 = arith.constant 0 : index
    %c0_9 = arith.constant 0 : index
    %11 = vector.load %arg3[%c0_7, %c0_8, %c0_9] : memref<3x8x4xf32, #tpu.memory_space<vmem>>, vector<1x8x4xf32>
    %12 = vector.shape_cast %11 : vector<1x8x4xf32> to vector<8x4xf32>
    %cst = arith.constant dense<0.000000e+00> : vector<8x16xf32>
    %13 = tpu.matmul %12, %10, %cst {dimension_numbers = #tpu.dot_dimension_numbers<[1], [0], [0], [1], [0, 0, 1, 1], [], []>} : vector<8x4xf32>, vector<4x16xf32>, vector<8x16xf32> -> vector<8x16xf32>
    %14 = arith.addf %9, %13 : vector<8x16xf32>
    %15 = vector.extract_strided_slice %6 {offsets = [0, 2], sizes = [4, 16], strides = [1, 1]} : vector<4x20xf32> to vector<4x16xf32>
    %c1 = arith.constant 1 : index
    %c0_10 = arith.constant 0 : index
    %c0_11 = arith.constant 0 : index
    %16 = vector.load %arg3[%c1, %c0_10, %c0_11] : memref<3x8x4xf32, #tpu.memory_space<vmem>>, vector<1x8x4xf32>
    %17 = vector.shape_cast %16 : vector<1x8x4xf32> to vector<8x4xf32>
    %cst_12 = arith.constant dense<0.000000e+00> : vector<8x16xf32>
    %18 = tpu.matmul %17, %15, %cst_12 {dimension_numbers = #tpu.dot_dimension_numbers<[1], [0], [0], [1], [0, 0, 1, 1], [], []>} : vector<8x4xf32>, vector<4x16xf32>, vector<8x16xf32> -> vector<8x16xf32>
    %19 = arith.addf %14, %18 : vector<8x16xf32>
    %20 = vector.extract_strided_slice %6 {offsets = [0, 4], sizes = [4, 16], strides = [1, 1]} : vector<4x20xf32> to vector<4x16xf32>
    %c2 = arith.constant 2 : index
    %c0_13 = arith.constant 0 : index
    %c0_14 = arith.constant 0 : index
    %21 = vector.load %arg3[%c2, %c0_13, %c0_14] : memref<3x8x4xf32, #tpu.memory_space<vmem>>, vector<1x8x4xf32>
    %22 = vector.shape_cast %21 : vector<1x8x4xf32> to vector<8x4xf32>
    %cst_15 = arith.constant dense<0.000000e+00> : vector<8x16xf32>
    %23 = tpu.matmul %22, %20, %cst_15 {dimension_numbers = #tpu.dot_dimension_numbers<[1], [0], [0], [1], [0, 0, 1, 1], [], []>} : vector<8x4xf32>, vector<4x16xf32>, vector<8x16xf32> -> vector<8x16xf32>
    %24 = arith.addf %19, %23 : vector<8x16xf32>
    %c0_16 = arith.constant 0 : index
    %c0_17 = arith.constant 0 : index
    %c0_18 = arith.constant 0 : index
    %25 = vector.load %arg5[%c0_16, %c0_17, %c0_18] : memref<1x8x16xf32, #tpu.memory_space<vmem>>, vector<1x8x16xf32>
    %26 = vector.shape_cast %25 : vector<1x8x16xf32> to vector<8x16xf32>
    %27 = vector.shape_cast %24 : vector<8x16xf32> to vector<1x8x16xf32>
    tpu.vector_store %arg5[%c0_16, %c0_17, %c0_18], %27 {strides = array<i32>} : memref<1x8x16xf32, #tpu.memory_space<vmem>>, vector<1x8x16xf32>,
    return
  }
  func.func @transform_0(%arg0: i32, %arg1: i32) -> (i32, i32, i32) {
    %c0_i32 = arith.constant 0 : i32
    %c0_i32_0 = arith.constant 0 : i32
    return %arg0, %c0_i32, %arg1 : i32, i32, i32
  }
  func.func @transform_1(%arg0: i32, %arg1: i32) -> (i32, i32, i32) {
    %c0_i32 = arith.constant 0 : i32
    %c0_i32_0 = arith.constant 0 : i32
    %c0_i32_1 = arith.constant 0 : i32
    %c0_i32_2 = arith.constant 0 : i32
    return %c0_i32, %c0_i32_0, %c0_i32_1 : i32, i32, i32
  }
  func.func @transform_2(%arg0: i32, %arg1: i32) -> (i32, i32) {
    %c0_i32 = arith.constant 0 : i32
    %c0_i32_0 = arith.constant 0 : i32
    %c0_i32_1 = arith.constant 0 : i32
    return %c0_i32, %c0_i32_0 : i32, i32
  }
  func.func @transform_3(%arg0: i32, %arg1: i32) -> (i32, i32, i32) {
    %c0_i32 = arith.constant 0 : i32
    %c0_i32_0 = arith.constant 0 : i32
    return %arg0, %c0_i32, %arg1 : i32, i32, i32
  }
}

</mosaic_0001>

<bundles_post_ra>
// kernel: tpu_custom_call.1
= control target key start
LH: loop header
LB: loop body
LE: loop exit
PB: predicated region body
PF: predicated region fallthrough
CT: control target
= control target key end

     0   :  { %8 = vsyncpa [#allocation4], 0  ;;  %s692_s0 = inlined_call_operand.vmem [shape: f32[2,4,16], index: 0, kind: input, shape index: {}]   ;;  %s693_s1 = inlined_call_operand.vmem [shape: f32[3,8,4], index: 1, kind: input, shape index: {}]   ;;  %s694_s2 = inlined_call_operand.vmem [shape: f32[8,1], index: 2, kind: input, shape index: {}]   ;;  %s695_s3 = inlined_call_operand.hbm [shape: f32[2,8,16], index: 3, kind: output, shape index: {}]  }
   0x1   :  { %10 = vsyncpa [#allocation4 + $0x1], 0  ;;  %s576_s12 = smov 0   ;;  %s578_s13 = smov 0  }
   0x2   :  { %s580_s14 = smov 0   ;;  %s582_s15 = smov 0  }
   0x3   :  { %s584_s16 = smov 0   ;;  %s586_s17 = smov 0  }
   0x4 LB: > { %s390_s18 = sadd.s32 4294967295, %s549_s17   ;;  %s391_s19 = sadd.s32 4294967294, %s549_s17   ;;  %s549_s17 = sphi %s586_s17, %s16_s17   ;;  %s545_s16 = sphi %s584_s16, %s702_s16   ;;  %s541_s15 = sphi %s582_s15, %s701_s15   ;;  %s537_s14 = sphi %s580_s14, %s700_s14   ;;  %s533_s13 = sphi %s578_s13, %s699_s13   ;;  %s529_s12 = sphi %s576_s12, %s698_s12  }
   0x5   : > { %s28_s20 = sadd.s32 1, %s545_s16  ;;  %s107_s21 = sadd.s32 1, %s537_s14 }
   0x6   : > { %p30_p0 = scmp.ge.s32.totalorder %s28_s20, 2  ;;  %p117_p1 = scmp.ne.s32.totalorder %s537_s14, %s533_s13 }
   0x7   : > { %p118_p2 = scmp.eq.s32.totalorder %s390_s18, 1  ;;  %p123_p3 = scmp.ne.s32.totalorder %s533_s13, %s529_s12 }
   0x8   : > { %s704_s20 = smov (%p30_p0, %s28_s20), 0  ;;  %p124_p5 = scmp.eq.s32.totalorder %s391_s19, 1 }
   0x9   : > { %p616_p4 = por %p118_p2, %p117_p1  ;;  %s102_s23 = ssub.s32 %s545_s16, %s704_s20 }
   0xa   : > { %p394_p6 = scmp.ge.s32.totalorder %s549_s17, 1  ;;  %p105_p7 = scmp.eq.s32.totalorder %s102_s23, 0 }
   0xb   : > { %p623_p8 = por %p124_p5, %p123_p3  ;;  %p158_p9 = scmp.lt.s32.totalorder %s549_s17, 3 }
   0xc   : > { %s629_s25 = scalar_select %p105_p7, %s537_s14, %s107_s21  }
   0xd   : > { %p159_p10 = pnand %p394_p6, %p158_p9 }
   0xe   : > { %p184_p11 = scmp.lt.s32.totalorder (!%p159_p10), %s541_s15, 1  ;;  %s551_s4 = smov (!%p159_p10), 4  }
   0xf   : > { %162 = sbr.rel (%p159_p10) target bundleno = 394 (0x18a), region = 32  ;;  %s553_s5 = smov (!%p159_p10), 126  }
  0x10   : > { %s554_s6 = smov (!%p159_p10), 124   ;;  %s181_s23 = sand.u32 (!%p159_p10), 1, %s533_s13  }
  0x11   : > { %s303_s7 = scalar_lea.sflag (!%p159_p10), [#allocation4], %s181_s23  ;;  %s491_s11 = scalar_lea.hbm (!%p159_p10), %s695_s3, 16 }
  0x14   : > { %s185_s26 = scalar_select %p184_p11, %s541_s15, 1  ;;  %vm195_vm0 = vcmask 27648   ;;  %v552_v1 = vmov 0.0   ;;  %vm203_vm1 = vcmask 31744   ;;  %vm215_vm2 = vcmask 1043456   ;;  %v211_v5 = vld [vmem:[%s693_s1] sm:$0xff] }
  0x15   : > { %196 = vst.msk [vmem:[#allocation2] sm:$0xf] %vm195_vm0, %v552_v1  ;;  %v205_v6 = vld [vmem:[%s694_s2] sm:$0xff]  ;;  %v555_v7 = vmov 0   ;;  %v402_v8 = vld [vmem:[%s693_s1 + $0x10] sm:$0xff]  ;;  %v399_v9 = vld [vmem:[%s693_s1 + $0x8] sm:$0xff] }
  0x16   : > { %s396_s27 = sshll.u32 %s185_s26, 2  ;;  %469 = vset.pattern.permute.xlu1 %v555_v7  ;;  %470 = vset.pattern.permute.xlu0 %v555_v7  ;;  %s395_s26 = sshll.u32 %s181_s23, 3  ;;  %vm300_vm3 = vcmask 130048  }
  0x17   : > { %s190_s30 = scalar_lea.vmem %s692_s0, %s396_s27  ;;  %s406_s27 = sshll.u32 %s541_s15, 3 }
  0x18   : > { %v198_v0 = vld [vmem:[%s190_s30] sm:$0xf]  ;;  %s314_s30 = scalar_lea.hbm %s695_s3, %s406_s27 }
  0x19   : > { %200 = vrot.lane.b32.xlu0 %v198_v0, %s551_s4  ;;  %s183_s4 = scalar_lea.vmem [#allocation3], %s395_s26 }
  0x1c   : > { %v197_v2 = vld [vmem:[#allocation2] sm:$0xf] }
  0x8b   : > { %v201_v3 = vpop.permute.xlu0 %200 }
  0x8c   : > { %v204_v4 = vsel %vm203_vm1, %v197_v2, %v201_v3 }
  0x8d   : > { %242 = vrot.lane.b32.xlu1 %v204_v4, %s553_s5  ;;  %272 = vrot.lane.b32.xlu0 %v204_v4, %s554_s6  ;;  %s316_s5 = sshll.u32 %s183_s4, 4  ;;  %s318_s6 = sshll.u32 %s314_s30, 4  ;;  %s317_s5 = int_to_ptr.vmem [resolvable:$true] %s316_s5  ;;  %s319_s6 = int_to_ptr.hbm [resolvable:$true] %s318_s6 }
  0x8e   : > { %397 = vmatpush.msk.msra.mxu0 %vm215_vm2, %v204_v4  ;;  %s485_s8 = sshra.s32 %s319_s6, 4  ;;  %s486_s8 = int_to_ptr.hbm [resolvable:$true] %s485_s8 }
  0x8f   : > { %398 = vmatmul.msk.f32.vlgmr.msra.gmra.mxu0 %vm203_vm1, %v211_v5  ;;  %s487_s15 = scalar_lea.hbm %s486_s8, 8  ;;  %p492_p1 = scmp.lt.s32.totalorder %s486_s8, %s695_s3 }
  0x90   : > { %p488_p12 = scmp.ne.s32.totalorder %s486_s8, %s487_s15  ;;  %p493_p2 = scmp.lt.s32.totalorder %s491_s11, %s487_s15 }
  0x92   : > { %p489_p13 = pnand %p488_p12, %p616_p4  ;;  %p494_p3 = por %p493_p2, %p492_p1 }
  0x94   : > { %p490_p0 = pneg %p489_p13 }
  0x95   : > { %208 = vperm.xlu1 %469, %v205_v6  }
  0x96   : > { %p495_p5 = pnand %p494_p3, %p490_p0 }
  0xff   : > { %v243_v10 = vpop.permute.xlu1 %242  ;;  %v273_v11 = vpop.permute.xlu0 %272 }
 0x100   : > { %400 = vmatpush.msk.msra.mxu1 %vm215_vm2, %v243_v10  ;;  %403 = vmatpush.msk.msra.mxu2 %vm215_vm2, %v273_v11 }
 0x101   : > { %404 = vmatmul.msk.f32.vlgmr.msra.gmra.mxu2 %vm203_vm1, %v402_v8  ;;  %401 = vmatmul.msk.f32.vlgmr.msra.gmra.mxu1 %vm203_vm1, %v399_v9 }
 0x107   : > { %v209_v12 = vpop.permute.xlu1 %208 }
 0x10c   : > { %v236_v13 = vpop.f32.mrf.mxu0 }
 0x10d   : > { %v239_v14 = vadd.f32 %v236_v13, %v209_v12 }
 0x17e   : > { %v266_v15 = vpop.f32.mrf.mxu1 }
 0x17f   : > { %v269_v16 = vadd.f32 %v266_v15, %v239_v14 }
 0x184   : > { %v296_v17 = vpop.f32.mrf.mxu2 }
 0x185   : > { %v299_v18 = vadd.f32 %v296_v17, %v269_v16 }
 0x187   : > { %301 = vst.msk [vmem:[%s183_s4] sm:$0xff] %vm300_vm3, %v299_v18 }
 0x188   : > { %498 = shalt.err (!%p495_p5)
}
 0x189   : > { %409 = dma.vmem_to_hbm [thread:$0]  (%p616_p4), %s317_s5, 128, %s319_s6, %s303_s7  }
 0x18a PF: > { %p415_p6 = scmp.ge.s32.totalorder %s549_s17, 2  ;;  %s330_s21 = sand.u32 1, %s529_s12  }
 0x18b   : > { %s331_s23 = scalar_lea.sflag [#allocation4], %s330_s21 }
 0x18c   : > { %p412_p7 = pnand %p415_p6, %p623_p8 }
 0x18e   : > { %p413_p9 = pneg %p412_p7 }
 0x190   : > { %524 = dma.done.wait (%p413_p9), %s331_s23, 128  }
 0x191   : > { %526 = vsyncadd (%p413_p9), %s331_s23, 4294967168  ;;  %s16_s17 = sadd.s32 1, %s549_s17   ;;  %s698_s12 = smov %s533_s13 }
 0x192   : > { %p13_p10 = scmp.ge.s32.totalorder %s16_s17, 4   ;;  %s699_s13 = smov %s537_s14 }
 0x193   : > { %s700_s14 = smov %s629_s25  ;;  %s701_s15 = smov %s545_s16 }
 0x194   : > { %s702_s16 = smov %s704_s20  ;;  %15 = sbr.rel (!%p13_p10) target bundleno = 4 (0x4), region = 73 }
 0x199   :  { %337 = vsyncpa [#allocation4], 1 }
 0x19a   :  { %339 = vsyncpa [#allocation4 + $0x1], 1 }

</bundles_post_ra>
